<compile_context>
chip_gen: v6e
topology: v6e:2x2x1
jax: 0.10.0
libtpu: 0.0.40
codegen_flags: <defaults>
</compile_context>

<pallas_src>
import numpy as np
import jax
import jax.numpy as jnp
from jax.experimental import pallas as pl
from jax.experimental.pallas import tpu as pltpu

# ---- small, module-consistent shapes ----
B = 2               # batch size
T = 8               # utterance length
D = 32              # embedding_dim
H = 32              # encoder_output_dim
E = 8               # max_num_entities
NUM_EDGE_TYPES = 3
TIMESTEPS = 2
T1 = T + 1          # utterance + null token
N = E + 1           # entities + global node
NE = NUM_EDGE_TYPES
G = 3 * D           # concatenated GRU gate width (r|z|n)


def graph_pruning_kernel(scores_ref, mask_ref, ent_ref, encp_ref, adj_ref,
                         wpd_ref, wpr_ref, bp_ref, gemb_ref,
                         wgi_ref, whh_ref, bih_ref, bhh_ref,
                         wrel_ref, brel_ref,
                         out_ref):
    f32 = jnp.float32
    bf16 = jnp.bfloat16

    # ---------- masked softmax over (null + utterance) positions ----------
    scores = scores_ref[0]                       # (E, T1)  (null column prepended)
    mask = mask_ref[0]                           # (1, T1)  (null position has mask 0)
    v = scores * mask
    ex = jnp.exp(v - jnp.max(v, axis=-1, keepdims=True))
    sm = ex * pl.reciprocal(jnp.sum(ex, axis=-1, keepdims=True), approx=True) * mask
    probs = sm * pl.reciprocal(jnp.sum(sm, axis=-1, keepdims=True) + 1e-13,
                               approx=True)      # (E, T1), null col exactly 0

    # ---------- entity initial embedding + fused projection ----------
    # init2 = ent @ w_pd + probs @ (enc @ w_pq) + r0 * w_pr + b_p
    r0 = jnp.max(probs, axis=-1, keepdims=True)                      # (E, 1)
    init2 = (jnp.dot(ent_ref[0].astype(bf16), wpd_ref[...].astype(bf16),
                     preferred_element_type=f32)
             + jnp.dot(probs.astype(bf16), encp_ref[0].astype(bf16),
                       preferred_element_type=f32)
             + r0 * wpr_ref[...] + bp_ref[...])                      # (E, D)

    # node states: entities followed by the global node
    h = jnp.concatenate([init2, gemb_ref[...]], axis=0)              # (N, D)

    # ---------- gated graph conv fused with the GRU input projection ----------
    adj = adj_ref[0].astype(bf16)               # (NE, N, N)  A[e, dst, src]
    whh_cat = whh_ref[...].astype(bf16)         # (D, G)
    bih = bih_ref[...]                          # (1, G)
    bhh = bhh_ref[...]                          # (1, G)

    for t in range(TIMESTEPS):
        hb = h.astype(bf16)
        # fused per-edge-type messages already in GRU-gate space:
        #   msg[:, e*G:(e+1)*G] = h @ (ggc_w[t, e] @ wih_cat)
        msg = jnp.dot(hb, wgi_ref[t].astype(bf16),
                      preferred_element_type=f32)                    # (N, NE*G)
        gi = bih                                                      # start from bias
        for e in range(NE):
            gi = gi + jnp.dot(adj[e], msg[:, e * G:(e + 1) * G].astype(bf16),
                              preferred_element_type=f32)            # (N, G)
        gh = jnp.dot(hb, whh_cat, preferred_element_type=f32) + bhh  # (N, G)
        # GRU cell (rnn_dropout is identity in eval mode)
        r = jax.nn.sigmoid(gi[:, :D] + gh[:, :D])
        z = jax.nn.sigmoid(gi[:, D:2 * D] + gh[:, D:2 * D])
        n = jnp.tanh(gi[:, 2 * D:] + r * gh[:, 2 * D:])
        h = (1.0 - z) * n + z * h

    # ---------- relevance logits on the VPU (drop the global node) ----------
    gnn_out = h[:E]                                                  # (E, D)
    logits = (jnp.sum(gnn_out * wrel_ref[...], axis=-1, keepdims=True)
              + brel_ref[...])                                       # (E, 1)

    # single lane-dense output slab: [probs (T1 lanes) | logits (1 lane)]
    out_ref[0, :, :T1] = probs
    out_ref[0, :, T1:] = logits


def _batch_spec(shape):
    rank = len(shape)
    block = (1,) + tuple(shape[1:])
    return pl.BlockSpec(block, lambda b, _r=rank: (b,) + (0,) * (_r - 1))


def _param_spec(shape):
    rank = len(shape)
    return pl.BlockSpec(tuple(shape), lambda b, _r=rank: (0,) * _r)


@jax.jit
def graph_pruning_forward(linking_scores, utterance_mask, entity_type_embeddings,
                          encoder_outputs, adjacency, p):
    hp = jax.lax.Precision.HIGHEST
    f32 = jnp.float32

    # glue: prepend the "null" column / position, reshape the mask
    scores_null = jnp.concatenate(
        [jnp.zeros((B, E, 1), f32), linking_scores], axis=-1)        # (B, E, T1)
    mask_null = jnp.concatenate(
        [jnp.zeros((B, 1), f32), utterance_mask], axis=-1).reshape(B, 1, T1)
    enc_pad = jnp.concatenate(
        [jnp.zeros((B, 1, H), f32), encoder_outputs], axis=1)        # (B, T1, H)

    # ---- wrapper-side fusion (pure reparameterization of module weights) ----
    # fold w_pq into the encoder outputs: the kernel's weighted sum lands
    # directly in embedding space (2 matmuls instead of 3 for the projection).
    enc_proj = jnp.einsum('bth,hd->btd', enc_pad, p['w_pq'], precision=hp)   # (B, T1, D)
    # GRU weights concatenated along the gate axis (r|z|n)
    wih_cat = jnp.transpose(p['wih'], (1, 0, 2)).reshape(D, G)       # (D, 3D)
    whh_cat = jnp.transpose(p['whh'], (1, 0, 2)).reshape(D, G)       # (D, 3D)
    bih_cat = p['bih'].reshape(1, G)
    bhh_cat = p['bhh'].reshape(1, G)
    # fold each per-edge-type GGNN weight into the GRU input projection:
    #   wgi[t][:, e*G:(e+1)*G] = ggc_w[t, e] @ wih_cat
    wgi = jnp.einsum('tedf,fc->tdec', p['ggc_w'], wih_cat,
                     precision=hp).reshape(TIMESTEPS, D, NE * G)     # (T, D, NE*3D)
    w_rel_row = p['w_rel'].reshape(1, D)                             # VPU-friendly row

    inputs = (scores_null, mask_null, entity_type_embeddings, enc_proj, adjacency,
              p['w_pd'], p['w_pr'], p['b_p'], p['g_emb'],
              wgi, whh_cat, bih_cat, bhh_cat, w_rel_row, p['b_rel'])

    in_specs = ([_batch_spec(a.shape) for a in inputs[:5]]
                + [_param_spec(a.shape) for a in inputs[5:]])

    out = pl.pallas_call(
        graph_pruning_kernel,
        out_shape=jax.ShapeDtypeStruct((B, E, T1 + 1), f32),
        grid=(B,),
        in_specs=in_specs,
        out_specs=_batch_spec((B, E, T1 + 1)),
        compiler_params=pltpu.CompilerParams(
            dimension_semantics=("parallel",)),
    )(*inputs)

    probs_full = out[:, :, :T1]                  # linking probs (with null column)
    logits = out[:, :, T1:]                      # (B, E, 1)
    relevance = jax.nn.sigmoid(logits)           # sigmoid in the wrapper (lane-dense kernel output)
    linking_probabilities = probs_full[:, :, 1:] # drop the null column (glue)
    return relevance, logits, linking_probabilities


# ------------------------------ reference ------------------------------
def reference_forward(linking_scores, utterance_mask, ent_emb, enc_out, adj, p):
    hp = jax.lax.Precision.HIGHEST
    scores_null = jnp.concatenate([jnp.zeros((B, E, 1)), linking_scores], -1)
    mask_null = jnp.concatenate([jnp.zeros((B, 1)), utterance_mask], -1)[:, None, :]
    v = scores_null * mask_null
    sm = jax.nn.softmax(v, axis=-1) * mask_null
    probs_full = sm / (sm.sum(-1, keepdims=True) + 1e-13)
    probs = probs_full[:, :, 1:]
    r0 = probs.max(-1, keepdims=True)
    q = jnp.einsum('bet,bth->beh', probs, enc_out, precision=hp)
    init2 = (jnp.einsum('bed,df->bef', ent_emb, p['w_pd'], precision=hp)
             + r0 * p['w_pr']
             + jnp.einsum('beh,hf->bef', q, p['w_pq'], precision=hp)
             + p['b_p'])
    h = jnp.concatenate([init2, jnp.tile(p['g_emb'][None], (B, 1, 1))], axis=1)
    for t in range(TIMESTEPS):
        m = jnp.zeros_like(h)
        for e in range(NUM_EDGE_TYPES):
            msg = jnp.einsum('bnd,df->bnf', h, p['ggc_w'][t, e], precision=hp)
            m = m + jnp.einsum('bij,bjf->bif', adj[:, e], msg, precision=hp)
        r = jax.nn.sigmoid(jnp.einsum('bnd,df->bnf', m, p['wih'][0], precision=hp) + p['bih'][0]
                           + jnp.einsum('bnd,df->bnf', h, p['whh'][0], precision=hp) + p['bhh'][0])
        z = jax.nn.sigmoid(jnp.einsum('bnd,df->bnf', m, p['wih'][1], precision=hp) + p['bih'][1]
                           + jnp.einsum('bnd,df->bnf', h, p['whh'][1], precision=hp) + p['bhh'][1])
        n = jnp.tanh(jnp.einsum('bnd,df->bnf', m, p['wih'][2], precision=hp) + p['bih'][2]
                     + r * (jnp.einsum('bnd,df->bnf', h, p['whh'][2], precision=hp) + p['bhh'][2]))
        h = (1.0 - z) * n + z * h
    gnn_out = h[:, :E]
    logits = jnp.einsum('bed,do->beo', gnn_out, p['w_rel'], precision=hp) + p['b_rel']
    return jax.nn.sigmoid(logits), logits, probs


# ------------------------------ setup ------------------------------
def make_params(key):
    ks = jax.random.split(key, 12)
    u = lambda k, shp: jax.random.uniform(k, shp, jnp.float32, -0.2, 0.2)
    return {
        # _ent_initial_proj: Linear(D + H + 1, D), stored pre-split & transposed
        'w_pd': u(ks[0], (D, D)),
        'w_pr': u(ks[1], (1, D)),
        'w_pq': u(ks[2], (H, D)),
        'b_p':  u(ks[3], (1, D)),
        # global node init embedding
        'g_emb': u(ks[4], (1, D)),
        # GatedGraphConv per-timestep / per-edge-type weights
        'ggc_w': u(ks[5], (TIMESTEPS, NUM_EDGE_TYPES, D, D)),
        # GRU cell, pre-split into (r, z, n) chunks, input-side transposed
        'wih': u(ks[6], (3, D, D)),
        'whh': u(ks[7], (3, D, D)),
        'bih': u(ks[8], (3, 1, D)),
        'bhh': u(ks[9], (3, 1, D)),
        # _predict_rel_ff: Linear(D, 1)
        'w_rel': u(ks[10], (D, 1)),
        'b_rel': u(ks[11], (1, 1)),
    }


def make_adjacency():
    # TODO(synk): deterministic synthetic graph standing in for
    # get_graph_adj_lists(world, ...) / torch_geometric Batch (data-dependent).
    adj = np.zeros((B, NUM_EDGE_TYPES, N, N), np.float32)   # A[b, e, dst, src]
    for b in range(B):
        for e in range(NUM_EDGE_TYPES):
            for i in range(E):
                j = (i + e + 1 + b) % E
                adj[b, e, j, i] = 1.0
        # edge type 0 connects every entity with the global node (both ways)
        adj[b, 0, N - 1, :E] = 1.0
        adj[b, 0, :E, N - 1] = 1.0
    return jnp.asarray(adj)


if __name__ == "__main__":
    key = jax.random.PRNGKey(0)
    k_p, k_s, k_e, k_o = jax.random.split(key, 4)

    params = make_params(k_p)
    linking_scores = jax.random.normal(k_s, (B, E, T), jnp.float32)
    entity_type_embeddings = 0.5 * jax.random.normal(k_e, (B, E, D), jnp.float32)
    encoder_outputs = 0.5 * jax.random.normal(k_o, (B, T, H), jnp.float32)
    utterance_mask = jnp.ones((B, T), jnp.float32).at[1, T - 2:].set(0.0)
    adjacency = make_adjacency()

    rel, logits, link_probs = graph_pruning_forward(
        linking_scores, utterance_mask, entity_type_embeddings,
        encoder_outputs, adjacency, params)
    jax.block_until_ready((rel, logits, link_probs))

    rel_r, logits_r, probs_r = reference_forward(
        linking_scores, utterance_mask, entity_type_embeddings,
        encoder_outputs, adjacency, params)
    np.testing.assert_allclose(np.asarray(link_probs), np.asarray(probs_r),
                               rtol=1e-2, atol=1e-2)
    np.testing.assert_allclose(np.asarray(logits), np.asarray(logits_r),
                               rtol=1e-2, atol=1e-2)
    np.testing.assert_allclose(np.asarray(rel), np.asarray(rel_r),
                               rtol=1e-2, atol=1e-2)

    print("KERNEL_OK")
</pallas_src>

<mosaic_0001>
module attributes {stable_mosaic.version = 11 : i64} {
  func.func @graph_pruning_kernel(%arg0: i32, %arg1: memref<1x8x9xf32, #tpu.memory_space<vmem>>, %arg2: memref<1x1x9xf32, #tpu.memory_space<vmem>>, %arg3: memref<1x8x32xf32, #tpu.memory_space<vmem>>, %arg4: memref<1x9x32xf32, #tpu.memory_space<vmem>>, %arg5: memref<1x3x9x9xf32, #tpu.memory_space<vmem>>, %arg6: memref<32x32xf32, #tpu.memory_space<vmem>>, %arg7: memref<1x32xf32, #tpu.memory_space<vmem>>, %arg8: memref<1x32xf32, #tpu.memory_space<vmem>>, %arg9: memref<1x32xf32, #tpu.memory_space<vmem>>, %arg10: memref<2x32x288xf32, #tpu.memory_space<vmem>>, %arg11: memref<32x96xf32, #tpu.memory_space<vmem>>, %arg12: memref<1x96xf32, #tpu.memory_space<vmem>>, %arg13: memref<1x96xf32, #tpu.memory_space<vmem>>, %arg14: memref<1x32xf32, #tpu.memory_space<vmem>>, %arg15: memref<1x1xf32, #tpu.memory_space<vmem>>, %arg16: memref<1x8x10xf32, #tpu.memory_space<vmem>>) attributes {dimension_semantics = [#tpu.dimension_semantics<parallel>], iteration_bounds = array<i64: 2>, scalar_prefetch = 0 : i64, scratch_operands = 0 : i64, tpu.core_type = #tpu.core_type<tc>, window_params = [{transform_indices = @transform_0, window_bounds = array<i64: 1, 8, 9>}, {transform_indices = @transform_1, window_bounds = array<i64: 1, 1, 9>}, {transform_indices = @transform_2, window_bounds = array<i64: 1, 8, 32>}, {transform_indices = @transform_3, window_bounds = array<i64: 1, 9, 32>}, {transform_indices = @transform_4, window_bounds = array<i64: 1, 3, 9, 9>}, {pipeline_mode = #tpu.pipeline_mode<synchronous>, transform_indices = @transform_5, window_bounds = array<i64: 32, 32>}, {pipeline_mode = #tpu.pipeline_mode<synchronous>, transform_indices = @transform_6, window_bounds = array<i64: 1, 32>}, {pipeline_mode = #tpu.pipeline_mode<synchronous>, transform_indices = @transform_7, window_bounds = array<i64: 1, 32>}, {pipeline_mode = #tpu.pipeline_mode<synchronous>, transform_indices = @transform_8, window_bounds = array<i64: 1, 32>}, {pipeline_mode = #tpu.pipeline_mode<synchronous>, transform_indices = @transform_9, window_bounds = array<i64: 2, 32, 288>}, {pipeline_mode = #tpu.pipeline_mode<synchronous>, transform_indices = @transform_10, window_bounds = array<i64: 32, 96>}, {pipeline_mode = #tpu.pipeline_mode<synchronous>, transform_indices = @transform_11, window_bounds = array<i64: 1, 96>}, {pipeline_mode = #tpu.pipeline_mode<synchronous>, transform_indices = @transform_12, window_bounds = array<i64: 1, 96>}, {pipeline_mode = #tpu.pipeline_mode<synchronous>, transform_indices = @transform_13, window_bounds = array<i64: 1, 32>}, {pipeline_mode = #tpu.pipeline_mode<synchronous>, transform_indices = @transform_14, window_bounds = array<i64: 1, 1>}, {transform_indices = @transform_15, window_bounds = array<i64: 1, 8, 10>}]} {
    %c0 = arith.constant 0 : index
    %c0_0 = arith.constant 0 : index
    %c0_1 = arith.constant 0 : index
    %0 = vector.load %arg1[%c0, %c0_0, %c0_1] : memref<1x8x9xf32, #tpu.memory_space<vmem>>, vector<1x8x9xf32>
    %1 = vector.shape_cast %0 : vector<1x8x9xf32> to vector<8x9xf32>
    %c0_2 = arith.constant 0 : index
    %c0_3 = arith.constant 0 : index
    %c0_4 = arith.constant 0 : index
    %2 = vector.load %arg2[%c0_2, %c0_3, %c0_4] : memref<1x1x9xf32, #tpu.memory_space<vmem>>, vector<1x1x9xf32>
    %3 = vector.shape_cast %2 : vector<1x1x9xf32> to vector<1x9xf32>
    %4 = vector.broadcast %3 : vector<1x9xf32> to vector<8x9xf32>
    %5 = arith.mulf %1, %4 : vector<8x9xf32>
    %cst = arith.constant dense<0xFF800000> : vector<8xf32>
    %6 = vector.multi_reduction <maximumf>, %5, %cst [1] : vector<8x9xf32> to vector<8xf32>
    %7 = vector.shape_cast %6 : vector<8xf32> to vector<8x1xf32>
    %8 = vector.broadcast %7 : vector<8x1xf32> to vector<8x9xf32>
    %9 = arith.subf %5, %8 : vector<8x9xf32>
    %10 = math.exp %9 : vector<8x9xf32>
    %cst_5 = arith.constant dense<0.000000e+00> : vector<8xf32>
    %11 = vector.multi_reduction <add>, %10, %cst_5 [1] : vector<8x9xf32> to vector<8xf32>
    %12 = vector.shape_cast %11 : vector<8xf32> to vector<8x1xf32>
    %13 = tpu.reciprocal %12 {approx = true} : vector<8x1xf32> -> vector<8x1xf32>
    %14 = vector.broadcast %13 : vector<8x1xf32> to vector<8x9xf32>
    %15 = arith.mulf %10, %14 : vector<8x9xf32>
    %16 = vector.broadcast %3 : vector<1x9xf32> to vector<8x9xf32>
    %17 = arith.mulf %15, %16 : vector<8x9xf32>
    %cst_6 = arith.constant dense<0.000000e+00> : vector<8xf32>
    %18 = vector.multi_reduction <add>, %17, %cst_6 [1] : vector<8x9xf32> to vector<8xf32>
    %19 = vector.shape_cast %18 : vector<8xf32> to vector<8x1xf32>
    %cst_7 = arith.constant 9.99999982E-14 : f32
    %20 = vector.broadcast %cst_7 : f32 to vector<8x1xf32>
    %21 = arith.addf %19, %20 : vector<8x1xf32>
    %22 = tpu.reciprocal %21 {approx = true} : vector<8x1xf32> -> vector<8x1xf32>
    %23 = vector.broadcast %22 : vector<8x1xf32> to vector<8x9xf32>
    %24 = arith.mulf %17, %23 : vector<8x9xf32>
    %cst_8 = arith.constant dense<0xFF800000> : vector<8xf32>
    %25 = vector.multi_reduction <maximumf>, %24, %cst_8 [1] : vector<8x9xf32> to vector<8xf32>
    %26 = vector.shape_cast %25 : vector<8xf32> to vector<8x1xf32>
    %c0_9 = arith.constant 0 : index
    %c0_10 = arith.constant 0 : index
    %c0_11 = arith.constant 0 : index
    %27 = vector.load %arg3[%c0_9, %c0_10, %c0_11] : memref<1x8x32xf32, #tpu.memory_space<vmem>>, vector<1x8x32xf32>
    %28 = vector.shape_cast %27 : vector<1x8x32xf32> to vector<8x32xf32>
    %29 = arith.truncf %28 : vector<8x32xf32> to vector<8x32xbf16>
    %c0_12 = arith.constant 0 : index
    %c0_13 = arith.constant 0 : index
    %30 = vector.load %arg6[%c0_12, %c0_13] : memref<32x32xf32, #tpu.memory_space<vmem>>, vector<32x32xf32>
    %31 = arith.truncf %30 : vector<32x32xf32> to vector<32x32xbf16>
    %cst_14 = arith.constant dense<0.000000e+00> : vector<8x32xf32>
    %32 = tpu.matmul %29, %31, %cst_14 {dimension_numbers = #tpu.dot_dimension_numbers<[1], [0], [0], [1], [0, 0, 1, 1], [], []>} : vector<8x32xbf16>, vector<32x32xbf16>, vector<8x32xf32> -> vector<8x32xf32>
    %33 = arith.truncf %24 : vector<8x9xf32> to vector<8x9xbf16>
    %c0_15 = arith.constant 0 : index
    %c0_16 = arith.constant 0 : index
    %c0_17 = arith.constant 0 : index
    %34 = vector.load %arg4[%c0_15, %c0_16, %c0_17] : memref<1x9x32xf32, #tpu.memory_space<vmem>>, vector<1x9x32xf32>
    %35 = vector.shape_cast %34 : vector<1x9x32xf32> to vector<9x32xf32>
    %36 = arith.truncf %35 : vector<9x32xf32> to vector<9x32xbf16>
    %cst_18 = arith.constant dense<0.000000e+00> : vector<8x32xf32>
    %37 = tpu.matmul %33, %36, %cst_18 {dimension_numbers = #tpu.dot_dimension_numbers<[1], [0], [0], [1], [0, 0, 1, 1], [], []>} : vector<8x9xbf16>, vector<9x32xbf16>, vector<8x32xf32> -> vector<8x32xf32>
    %38 = arith.addf %32, %37 : vector<8x32xf32>
    %c0_19 = arith.constant 0 : index
    %c0_20 = arith.constant 0 : index
    %39 = vector.load %arg7[%c0_19, %c0_20] : memref<1x32xf32, #tpu.memory_space<vmem>>, vector<1x32xf32>
    %40 = vector.broadcast %26 : vector<8x1xf32> to vector<8x32xf32>
    %41 = vector.broadcast %39 : vector<1x32xf32> to vector<8x32xf32>
    %42 = arith.mulf %40, %41 : vector<8x32xf32>
    %43 = arith.addf %38, %42 : vector<8x32xf32>
    %c0_21 = arith.constant 0 : index
    %c0_22 = arith.constant 0 : index
    %44 = vector.load %arg8[%c0_21, %c0_22] : memref<1x32xf32, #tpu.memory_space<vmem>>, vector<1x32xf32>
    %45 = vector.broadcast %44 : vector<1x32xf32> to vector<8x32xf32>
    %46 = arith.addf %43, %45 : vector<8x32xf32>
    %c0_23 = arith.constant 0 : index
    %c0_24 = arith.constant 0 : index
    %47 = vector.load %arg9[%c0_23, %c0_24] : memref<1x32xf32, #tpu.memory_space<vmem>>, vector<1x32xf32>
    %48 = tpu.concatenate %46, %47 in 0 : vector<8x32xf32>, vector<1x32xf32> -> vector<9x32xf32>
    %c0_25 = arith.constant 0 : index
    %c0_26 = arith.constant 0 : index
    %c0_27 = arith.constant 0 : index
    %c0_28 = arith.constant 0 : index
    %49 = vector.load %arg5[%c0_25, %c0_26, %c0_27, %c0_28] : memref<1x3x9x9xf32, #tpu.memory_space<vmem>>, vector<1x3x9x9xf32>
    %50 = vector.shape_cast %49 : vector<1x3x9x9xf32> to vector<3x9x9xf32>
    %51 = arith.truncf %50 : vector<3x9x9xf32> to vector<3x9x9xbf16>
    %c0_29 = arith.constant 0 : index
    %c0_30 = arith.constant 0 : index
    %52 = vector.load %arg11[%c0_29, %c0_30] : memref<32x96xf32, #tpu.memory_space<vmem>>, vector<32x96xf32>
    %53 = arith.truncf %52 : vector<32x96xf32> to vector<32x96xbf16>
    %c0_31 = arith.constant 0 : index
    %c0_32 = arith.constant 0 : index
    %54 = vector.load %arg12[%c0_31, %c0_32] : memref<1x96xf32, #tpu.memory_space<vmem>>, vector<1x96xf32>
    %c0_33 = arith.constant 0 : index
    %c0_34 = arith.constant 0 : index
    %55 = vector.load %arg13[%c0_33, %c0_34] : memref<1x96xf32, #tpu.memory_space<vmem>>, vector<1x96xf32>
    %56 = arith.truncf %48 : vector<9x32xf32> to vector<9x32xbf16>
    %c0_35 = arith.constant 0 : index
    %c0_36 = arith.constant 0 : index
    %c0_37 = arith.constant 0 : index
    %57 = vector.load %arg10[%c0_35, %c0_36, %c0_37] : memref<2x32x288xf32, #tpu.memory_space<vmem>>, vector<1x32x288xf32>
    %58 = vector.shape_cast %57 : vector<1x32x288xf32> to vector<32x288xf32>
    %59 = arith.truncf %58 : vector<32x288xf32> to vector<32x288xbf16>
    %cst_38 = arith.constant dense<0.000000e+00> : vector<9x288xf32>
    %60 = tpu.matmul %56, %59, %cst_38 {dimension_numbers = #tpu.dot_dimension_numbers<[1], [0], [0], [1], [0, 0, 1, 1], [], []>} : vector<9x32xbf16>, vector<32x288xbf16>, vector<9x288xf32> -> vector<9x288xf32>
    %61 = vector.extract_strided_slice %51 {offsets = [0, 0, 0], sizes = [1, 9, 9], strides = [1, 1, 1]} : vector<3x9x9xbf16> to vector<1x9x9xbf16>
    %62 = vector.shape_cast %61 : vector<1x9x9xbf16> to vector<9x9xbf16>
    %63 = vector.extract_strided_slice %60 {offsets = [0, 0], sizes = [9, 96], strides = [1, 1]} : vector<9x288xf32> to vector<9x96xf32>
    %64 = arith.truncf %63 : vector<9x96xf32> to vector<9x96xbf16>
    %cst_39 = arith.constant dense<0.000000e+00> : vector<9x96xf32>
    %65 = tpu.matmul %62, %64, %cst_39 {dimension_numbers = #tpu.dot_dimension_numbers<[1], [0], [0], [1], [0, 0, 1, 1], [], []>} : vector<9x9xbf16>, vector<9x96xbf16>, vector<9x96xf32> -> vector<9x96xf32>
    %66 = vector.broadcast %54 : vector<1x96xf32> to vector<9x96xf32>
    %67 = arith.addf %66, %65 : vector<9x96xf32>
    %68 = vector.extract_strided_slice %51 {offsets = [1, 0, 0], sizes = [1, 9, 9], strides = [1, 1, 1]} : vector<3x9x9xbf16> to vector<1x9x9xbf16>
    %69 = vector.shape_cast %68 : vector<1x9x9xbf16> to vector<9x9xbf16>
    %70 = vector.extract_strided_slice %60 {offsets = [0, 96], sizes = [9, 96], strides = [1, 1]} : vector<9x288xf32> to vector<9x96xf32>
    %71 = arith.truncf %70 : vector<9x96xf32> to vector<9x96xbf16>
    %cst_40 = arith.constant dense<0.000000e+00> : vector<9x96xf32>
    %72 = tpu.matmul %69, %71, %cst_40 {dimension_numbers = #tpu.dot_dimension_numbers<[1], [0], [0], [1], [0, 0, 1, 1], [], []>} : vector<9x9xbf16>, vector<9x96xbf16>, vector<9x96xf32> -> vector<9x96xf32>
    %73 = arith.addf %67, %72 : vector<9x96xf32>
    %74 = vector.extract_strided_slice %51 {offsets = [2, 0, 0], sizes = [1, 9, 9], strides = [1, 1, 1]} : vector<3x9x9xbf16> to vector<1x9x9xbf16>
    %75 = vector.shape_cast %74 : vector<1x9x9xbf16> to vector<9x9xbf16>
    %76 = vector.extract_strided_slice %60 {offsets = [0, 192], sizes = [9, 96], strides = [1, 1]} : vector<9x288xf32> to vector<9x96xf32>
    %77 = arith.truncf %76 : vector<9x96xf32> to vector<9x96xbf16>
    %cst_41 = arith.constant dense<0.000000e+00> : vector<9x96xf32>
    %78 = tpu.matmul %75, %77, %cst_41 {dimension_numbers = #tpu.dot_dimension_numbers<[1], [0], [0], [1], [0, 0, 1, 1], [], []>} : vector<9x9xbf16>, vector<9x96xbf16>, vector<9x96xf32> -> vector<9x96xf32>
    %79 = arith.addf %73, %78 : vector<9x96xf32>
    %cst_42 = arith.constant dense<0.000000e+00> : vector<9x96xf32>
    %80 = tpu.matmul %56, %53, %cst_42 {dimension_numbers = #tpu.dot_dimension_numbers<[1], [0], [0], [1], [0, 0, 1, 1], [], []>} : vector<9x32xbf16>, vector<32x96xbf16>, vector<9x96xf32> -> vector<9x96xf32>
    %81 = vector.broadcast %55 : vector<1x96xf32> to vector<9x96xf32>
    %82 = arith.addf %80, %81 : vector<9x96xf32>
    %83 = vector.extract_strided_slice %79 {offsets = [0, 0], sizes = [9, 32], strides = [1, 1]} : vector<9x96xf32> to vector<9x32xf32>
    %84 = vector.extract_strided_slice %82 {offsets = [0, 0], sizes = [9, 32], strides = [1, 1]} : vector<9x96xf32> to vector<9x32xf32>
    %85 = arith.addf %83, %84 : vector<9x32xf32>
    %86 = arith.negf %85 : vector<9x32xf32>
    %87 = math.exp %86 : vector<9x32xf32>
    %cst_43 = arith.constant 1.000000e+00 : f32
    %88 = vector.broadcast %cst_43 : f32 to vector<9x32xf32>
    %89 = arith.addf %88, %87 : vector<9x32xf32>
    %90 = arith.divf %88, %89 : vector<9x32xf32>
    %91 = vector.extract_strided_slice %79 {offsets = [0, 32], sizes = [9, 32], strides = [1, 1]} : vector<9x96xf32> to vector<9x32xf32>
    %92 = vector.extract_strided_slice %82 {offsets = [0, 32], sizes = [9, 32], strides = [1, 1]} : vector<9x96xf32> to vector<9x32xf32>
    %93 = arith.addf %91, %92 : vector<9x32xf32>
    %94 = arith.negf %93 : vector<9x32xf32>
    %95 = math.exp %94 : vector<9x32xf32>
    %cst_44 = arith.constant 1.000000e+00 : f32
    %96 = vector.broadcast %cst_44 : f32 to vector<9x32xf32>
    %97 = arith.addf %96, %95 : vector<9x32xf32>
    %98 = arith.divf %96, %97 : vector<9x32xf32>
    %99 = vector.extract_strided_slice %79 {offsets = [0, 64], sizes = [9, 32], strides = [1, 1]} : vector<9x96xf32> to vector<9x32xf32>
    %100 = vector.extract_strided_slice %82 {offsets = [0, 64], sizes = [9, 32], strides = [1, 1]} : vector<9x96xf32> to vector<9x32xf32>
    %101 = arith.mulf %90, %100 : vector<9x32xf32>
    %102 = arith.addf %99, %101 : vector<9x32xf32>
    %103 = math.tanh %102 : vector<9x32xf32>
    %cst_45 = arith.constant 1.000000e+00 : f32
    %104 = vector.broadcast %cst_45 : f32 to vector<9x32xf32>
    %105 = arith.subf %104, %98 : vector<9x32xf32>
    %106 = arith.mulf %105, %103 : vector<9x32xf32>
    %107 = arith.mulf %98, %48 : vector<9x32xf32>
    %108 = arith.addf %106, %107 : vector<9x32xf32>
    %109 = arith.truncf %108 : vector<9x32xf32> to vector<9x32xbf16>
    %c1 = arith.constant 1 : index
    %c0_46 = arith.constant 0 : index
    %c0_47 = arith.constant 0 : index
    %110 = vector.load %arg10[%c1, %c0_46, %c0_47] : memref<2x32x288xf32, #tpu.memory_space<vmem>>, vector<1x32x288xf32>
    %111 = vector.shape_cast %110 : vector<1x32x288xf32> to vector<32x288xf32>
    %112 = arith.truncf %111 : vector<32x288xf32> to vector<32x288xbf16>
    %cst_48 = arith.constant dense<0.000000e+00> : vector<9x288xf32>
    %113 = tpu.matmul %109, %112, %cst_48 {dimension_numbers = #tpu.dot_dimension_numbers<[1], [0], [0], [1], [0, 0, 1, 1], [], []>} : vector<9x32xbf16>, vector<32x288xbf16>, vector<9x288xf32> -> vector<9x288xf32>
    %114 = vector.extract_strided_slice %51 {offsets = [0, 0, 0], sizes = [1, 9, 9], strides = [1, 1, 1]} : vector<3x9x9xbf16> to vector<1x9x9xbf16>
    %115 = vector.shape_cast %114 : vector<1x9x9xbf16> to vector<9x9xbf16>
    %116 = vector.extract_strided_slice %113 {offsets = [0, 0], sizes = [9, 96], strides = [1, 1]} : vector<9x288xf32> to vector<9x96xf32>
    %117 = arith.truncf %116 : vector<9x96xf32> to vector<9x96xbf16>
    %cst_49 = arith.constant dense<0.000000e+00> : vector<9x96xf32>
    %118 = tpu.matmul %115, %117, %cst_49 {dimension_numbers = #tpu.dot_dimension_numbers<[1], [0], [0], [1], [0, 0, 1, 1], [], []>} : vector<9x9xbf16>, vector<9x96xbf16>, vector<9x96xf32> -> vector<9x96xf32>
    %119 = vector.broadcast %54 : vector<1x96xf32> to vector<9x96xf32>
    %120 = arith.addf %119, %118 : vector<9x96xf32>
    %121 = vector.extract_strided_slice %51 {offsets = [1, 0, 0], sizes = [1, 9, 9], strides = [1, 1, 1]} : vector<3x9x9xbf16> to vector<1x9x9xbf16>
    %122 = vector.shape_cast %121 : vector<1x9x9xbf16> to vector<9x9xbf16>
    %123 = vector.extract_strided_slice %113 {offsets = [0, 96], sizes = [9, 96], strides = [1, 1]} : vector<9x288xf32> to vector<9x96xf32>
    %124 = arith.truncf %123 : vector<9x96xf32> to vector<9x96xbf16>
    %cst_50 = arith.constant dense<0.000000e+00> : vector<9x96xf32>
    %125 = tpu.matmul %122, %124, %cst_50 {dimension_numbers = #tpu.dot_dimension_numbers<[1], [0], [0], [1], [0, 0, 1, 1], [], []>} : vector<9x9xbf16>, vector<9x96xbf16>, vector<9x96xf32> -> vector<9x96xf32>
    %126 = arith.addf %120, %125 : vector<9x96xf32>
    %127 = vector.extract_strided_slice %51 {offsets = [2, 0, 0], sizes = [1, 9, 9], strides = [1, 1, 1]} : vector<3x9x9xbf16> to vector<1x9x9xbf16>
    %128 = vector.shape_cast %127 : vector<1x9x9xbf16> to vector<9x9xbf16>
    %129 = vector.extract_strided_slice %113 {offsets = [0, 192], sizes = [9, 96], strides = [1, 1]} : vector<9x288xf32> to vector<9x96xf32>
    %130 = arith.truncf %129 : vector<9x96xf32> to vector<9x96xbf16>
    %cst_51 = arith.constant dense<0.000000e+00> : vector<9x96xf32>
    %131 = tpu.matmul %128, %130, %cst_51 {dimension_numbers = #tpu.dot_dimension_numbers<[1], [0], [0], [1], [0, 0, 1, 1], [], []>} : vector<9x9xbf16>, vector<9x96xbf16>, vector<9x96xf32> -> vector<9x96xf32>
    %132 = arith.addf %126, %131 : vector<9x96xf32>
    %cst_52 = arith.constant dense<0.000000e+00> : vector<9x96xf32>
    %133 = tpu.matmul %109, %53, %cst_52 {dimension_numbers = #tpu.dot_dimension_numbers<[1], [0], [0], [1], [0, 0, 1, 1], [], []>} : vector<9x32xbf16>, vector<32x96xbf16>, vector<9x96xf32> -> vector<9x96xf32>
    %134 = vector.broadcast %55 : vector<1x96xf32> to vector<9x96xf32>
    %135 = arith.addf %133, %134 : vector<9x96xf32>
    %136 = vector.extract_strided_slice %132 {offsets = [0, 0], sizes = [9, 32], strides = [1, 1]} : vector<9x96xf32> to vector<9x32xf32>
    %137 = vector.extract_strided_slice %135 {offsets = [0, 0], sizes = [9, 32], strides = [1, 1]} : vector<9x96xf32> to vector<9x32xf32>
    %138 = arith.addf %136, %137 : vector<9x32xf32>
    %139 = arith.negf %138 : vector<9x32xf32>
    %140 = math.exp %139 : vector<9x32xf32>
    %cst_53 = arith.constant 1.000000e+00 : f32
    %141 = vector.broadcast %cst_53 : f32 to vector<9x32xf32>
    %142 = arith.addf %141, %140 : vector<9x32xf32>
    %143 = arith.divf %141, %142 : vector<9x32xf32>
    %144 = vector.extract_strided_slice %132 {offsets = [0, 32], sizes = [9, 32], strides = [1, 1]} : vector<9x96xf32> to vector<9x32xf32>
    %145 = vector.extract_strided_slice %135 {offsets = [0, 32], sizes = [9, 32], strides = [1, 1]} : vector<9x96xf32> to vector<9x32xf32>
    %146 = arith.addf %144, %145 : vector<9x32xf32>
    %147 = arith.negf %146 : vector<9x32xf32>
    %148 = math.exp %147 : vector<9x32xf32>
    %cst_54 = arith.constant 1.000000e+00 : f32
    %149 = vector.broadcast %cst_54 : f32 to vector<9x32xf32>
    %150 = arith.addf %149, %148 : vector<9x32xf32>
    %151 = arith.divf %149, %150 : vector<9x32xf32>
    %152 = vector.extract_strided_slice %132 {offsets = [0, 64], sizes = [9, 32], strides = [1, 1]} : vector<9x96xf32> to vector<9x32xf32>
    %153 = vector.extract_strided_slice %135 {offsets = [0, 64], sizes = [9, 32], strides = [1, 1]} : vector<9x96xf32> to vector<9x32xf32>
    %154 = arith.mulf %143, %153 : vector<9x32xf32>
    %155 = arith.addf %152, %154 : vector<9x32xf32>
    %156 = math.tanh %155 : vector<9x32xf32>
    %cst_55 = arith.constant 1.000000e+00 : f32
    %157 = vector.broadcast %cst_55 : f32 to vector<9x32xf32>
    %158 = arith.subf %157, %151 : vector<9x32xf32>
    %159 = arith.mulf %158, %156 : vector<9x32xf32>
    %160 = arith.mulf %151, %108 : vector<9x32xf32>
    %161 = arith.addf %159, %160 : vector<9x32xf32>
    %162 = vector.extract_strided_slice %161 {offsets = [0, 0], sizes = [8, 32], strides = [1, 1]} : vector<9x32xf32> to vector<8x32xf32>
    %c0_56 = arith.constant 0 : index
    %c0_57 = arith.constant 0 : index
    %163 = vector.load %arg14[%c0_56, %c0_57] : memref<1x32xf32, #tpu.memory_space<vmem>>, vector<1x32xf32>
    %164 = vector.broadcast %163 : vector<1x32xf32> to vector<8x32xf32>
    %165 = arith.mulf %162, %164 : vector<8x32xf32>
    %cst_58 = arith.constant dense<0.000000e+00> : vector<8xf32>
    %166 = vector.multi_reduction <add>, %165, %cst_58 [1] : vector<8x32xf32> to vector<8xf32>
    %167 = vector.shape_cast %166 : vector<8xf32> to vector<8x1xf32>
    %c0_59 = arith.constant 0 : index
    %c0_60 = arith.constant 0 : index
    %168 = vector.load %arg15[%c0_59, %c0_60] : memref<1x1xf32, #tpu.memory_space<vmem>>, vector<1x1xf32>
    %169 = vector.broadcast %168 : vector<1x1xf32> to vector<8x1xf32>
    %170 = arith.addf %167, %169 : vector<8x1xf32>
    %c0_61 = arith.constant 0 : index
    %c0_62 = arith.constant 0 : index
    %c0_63 = arith.constant 0 : index
    %171 = vector.load %arg16[%c0_61, %c0_62, %c0_63] : memref<1x8x10xf32, #tpu.memory_space<vmem>>, vector<1x8x9xf32>
    %172 = vector.shape_cast %171 : vector<1x8x9xf32> to vector<8x9xf32>
    %173 = vector.shape_cast %24 : vector<8x9xf32> to vector<1x8x9xf32>
    tpu.vector_store %arg16[%c0_61, %c0_62, %c0_63], %173 {strides = array<i32>} : memref<1x8x10xf32, #tpu.memory_space<vmem>>, vector<1x8x9xf32>,
    %c0_64 = arith.constant 0 : index
    %c0_65 = arith.constant 0 : index
    %c9 = arith.constant 9 : index
    %174 = vector.load %arg16[%c0_64, %c0_65, %c9] : memref<1x8x10xf32, #tpu.memory_space<vmem>>, vector<1x8x1xf32>
    %175 = vector.shape_cast %174 : vector<1x8x1xf32> to vector<8x1xf32>
    %176 = vector.shape_cast %170 : vector<8x1xf32> to vector<1x8x1xf32>
    tpu.vector_store %arg16[%c0_64, %c0_65, %c9], %176 {strides = array<i32>} : memref<1x8x10xf32, #tpu.memory_space<vmem>>, vector<1x8x1xf32>,
    return
  }
  func.func @transform_0(%arg0: i32) -> (i32, i32, i32) {
    %c0_i32 = arith.constant 0 : i32
    %c0_i32_0 = arith.constant 0 : i32
    %c0_i32_1 = arith.constant 0 : i32
    return %arg0, %c0_i32, %c0_i32_0 : i32, i32, i32
  }
  func.func @transform_1(%arg0: i32) -> (i32, i32, i32) {
    %c0_i32 = arith.constant 0 : i32
    %c0_i32_0 = arith.constant 0 : i32
    %c0_i32_1 = arith.constant 0 : i32
    return %arg0, %c0_i32, %c0_i32_0 : i32, i32, i32
  }
  func.func @transform_2(%arg0: i32) -> (i32, i32, i32) {
    %c0_i32 = arith.constant 0 : i32
    %c0_i32_0 = arith.constant 0 : i32
    %c0_i32_1 = arith.constant 0 : i32
    return %arg0, %c0_i32, %c0_i32_0 : i32, i32, i32
  }
  func.func @transform_3(%arg0: i32) -> (i32, i32, i32) {
    %c0_i32 = arith.constant 0 : i32
    %c0_i32_0 = arith.constant 0 : i32
    %c0_i32_1 = arith.constant 0 : i32
    return %arg0, %c0_i32, %c0_i32_0 : i32, i32, i32
  }
  func.func @transform_4(%arg0: i32) -> (i32, i32, i32, i32) {
    %c0_i32 = arith.constant 0 : i32
    %c0_i32_0 = arith.constant 0 : i32
    %c0_i32_1 = arith.constant 0 : i32
    %c0_i32_2 = arith.constant 0 : i32
    return %arg0, %c0_i32, %c0_i32_0, %c0_i32_1 : i32, i32, i32, i32
  }
  func.func @transform_5(%arg0: i32) -> (i32, i32) {
    %c0_i32 = arith.constant 0 : i32
    %c0_i32_0 = arith.constant 0 : i32
    %c0_i32_1 = arith.constant 0 : i32
    return %c0_i32, %c0_i32_0 : i32, i32
  }
  func.func @transform_6(%arg0: i32) -> (i32, i32) {
    %c0_i32 = arith.constant 0 : i32
    %c0_i32_0 = arith.constant 0 : i32
    %c0_i32_1 = arith.constant 0 : i32
    return %c0_i32, %c0_i32_0 : i32, i32
  }
  func.func @transform_7(%arg0: i32) -> (i32, i32) {
    %c0_i32 = arith.constant 0 : i32
    %c0_i32_0 = arith.constant 0 : i32
    %c0_i32_1 = arith.constant 0 : i32
    return %c0_i32, %c0_i32_0 : i32, i32
  }
  func.func @transform_8(%arg0: i32) -> (i32, i32) {
    %c0_i32 = arith.constant 0 : i32
    %c0_i32_0 = arith.constant 0 : i32
    %c0_i32_1 = arith.constant 0 : i32
    return %c0_i32, %c0_i32_0 : i32, i32
  }
  func.func @transform_9(%arg0: i32) -> (i32, i32, i32) {
    %c0_i32 = arith.constant 0 : i32
    %c0_i32_0 = arith.constant 0 : i32
    %c0_i32_1 = arith.constant 0 : i32
    %c0_i32_2 = arith.constant 0 : i32
    return %c0_i32, %c0_i32_0, %c0_i32_1 : i32, i32, i32
  }
  func.func @transform_10(%arg0: i32) -> (i32, i32) {
    %c0_i32 = arith.constant 0 : i32
    %c0_i32_0 = arith.constant 0 : i32
    %c0_i32_1 = arith.constant 0 : i32
    return %c0_i32, %c0_i32_0 : i32, i32
  }
  func.func @transform_11(%arg0: i32) -> (i32, i32) {
    %c0_i32 = arith.constant 0 : i32
    %c0_i32_0 = arith.constant 0 : i32
    %c0_i32_1 = arith.constant 0 : i32
    return %c0_i32, %c0_i32_0 : i32, i32
  }
  func.func @transform_12(%arg0: i32) -> (i32, i32) {
    %c0_i32 = arith.constant 0 : i32
    %c0_i32_0 = arith.constant 0 : i32
    %c0_i32_1 = arith.constant 0 : i32
    return %c0_i32, %c0_i32_0 : i32, i32
  }
  func.func @transform_13(%arg0: i32) -> (i32, i32) {
    %c0_i32 = arith.constant 0 : i32
    %c0_i32_0 = arith.constant 0 : i32
    %c0_i32_1 = arith.constant 0 : i32
    return %c0_i32, %c0_i32_0 : i32, i32
  }
  func.func @transform_14(%arg0: i32) -> (i32, i32) {
    %c0_i32 = arith.constant 0 : i32
    %c0_i32_0 = arith.constant 0 : i32
    %c0_i32_1 = arith.constant 0 : i32
    return %c0_i32, %c0_i32_0 : i32, i32
  }
  func.func @transform_15(%arg0: i32) -> (i32, i32, i32) {
    %c0_i32 = arith.constant 0 : i32
    %c0_i32_0 = arith.constant 0 : i32
    %c0_i32_1 = arith.constant 0 : i32
    return %arg0, %c0_i32, %c0_i32_0 : i32, i32, i32
  }
}

</mosaic_0001>

<bundles_post_ra>
// kernel: graph_pruning_forward.1
= control target key start
LH: loop header
LB: loop body
LE: loop exit
PB: predicated region body
PF: predicated region fallthrough
CT: control target
= control target key end

     0   :  { %s1875_s20 = smov 0   ;;  %s2186_s0 = inlined_call_operand.vmem [shape: f32[2,8,9], index: 0, kind: input, shape index: {}]   ;;  %s2187_s1 = inlined_call_operand.vmem [shape: f32[2,1,9], index: 1, kind: input, shape index: {}]   ;;  %s2188_s2 = inlined_call_operand.vmem [shape: f32[2,8,32], index: 2, kind: input, shape index: {}]   ;;  %s2189_s3 = inlined_call_operand.vmem [shape: f32[2,9,32], index: 3, kind: input, shape index: {}]   ;;  %s2190_s4 = inlined_call_operand.vmem [shape: f32[2,3,9,9], index: 4, kind: input, shape index: {}]   ;;  %s2191_s5 = inlined_call_operand.vmem [shape: f32[32,32], index: 5, kind: input, shape index: {}]   ;;  %s2192_s6 = inlined_call_operand.vmem [shape: f32[1,32], index: 6, kind: input, shape index: {}]   ;;  %s2193_s7 = inlined_call_operand.vmem [shape: f32[1,32], index: 7, kind: input, shape index: {}]   ;;  %s2194_s8 = inlined_call_operand.vmem [shape: f32[1,32], index: 8, kind: input, shape index: {}]   ;;  %s2195_s9 = inlined_call_operand.vmem [shape: f32[2,32,288], index: 9, kind: input, shape index: {}]   ;;  %s2196_s10 = inlined_call_operand.vmem [shape: f32[32,96], index: 10, kind: input, shape index: {}]   ;;  %s2197_s11 = inlined_call_operand.vmem [shape: f32[1,96], index: 11, kind: input, shape index: {}]   ;;  %s2198_s12 = inlined_call_operand.vmem [shape: f32[1,96], index: 12, kind: input, shape index: {}]   ;;  %s2199_s13 = inlined_call_operand.vmem [shape: f32[1,32], index: 13, kind: input, shape index: {}]   ;;  %s2200_s14 = inlined_call_operand.<no memory space> [shape: f32[1,1], index: 14, kind: input, shape index: {}]   ;;  %s2201_s15 = inlined_call_operand.vmem [shape: f32[2,8,10], index: 15, kind: output, shape index: {}]  }
   0x1   :  { %v20_v0 = vstv %s2200_s14 }
   0x2   :  { %21 = vst [vmem:[#allocation2] sm:$0x1] %v20_v0 }
   0x3 LB: > { %s1574_s21 = sadd.s32 4294967295, %s1782_s20   ;;  %p1578_p0 = scmp.ge.s32.totalorder %s1782_s20, 1  ;;  %s1782_s20 = sphi %s1875_s20, %s27_s20  }
   0x4   : > { %p475_p1 = scmp.lt.s32.totalorder %s1782_s20, 3 }
   0x6   : > { %p476_p2 = pnand %p1578_p0, %p475_p1 }
   0x7   : > { %p538_p3 = scmp.lt.s32.totalorder (!%p476_p2), %s1574_s21, 1  ;;  %s1790_s28 = smov (!%p476_p2), 96  }
   0x8   : > { %479 = sbr.rel (%p476_p2) target bundleno = 2976 (0xba0), region = 80 }
   0xd   : > { %s2203_s21 = smov (!%p538_p3, %s1574_s21), 1  ;;  %vm573_vm0 = vcmask 72704   ;;  %v599_v15 = vld [vmem:[%s2191_s5 + $0x10] sm:$0xff]  ;;  %v600_v16 = vld [vmem:[%s2191_s5 + $0x18] sm:$0xff]  ;;  %v597_v17 = vld [vmem:[%s2191_s5] sm:$0xff]  ;;  %v1784_v18 = vmov 0.0  }
   0xe   : > { %s1886_s14 = sshll.u32 %s2203_s21, 3  ;;  %s544_s24 = scalar_lea.vmem %s2187_s1, %s2203_s21  ;;  %1659 = vmatprep.subr.bf16.mxu1 %v1784_v18  ;;  %v602_v19 = vpack.c.bf16 %v600_v16, %v599_v15  ;;  %v598_v20 = vld [vmem:[%s2191_s5 + $0x8] sm:$0xff]  ;;  %vm1785_vm1 = vmmov 0   ;;  %vm610_vm2 = vcmask 1043456   ;;  %vm611_vm3 = vcmask 1044480   ;;  %1653 = vmatprep.subr.bf16.mxu0 %v1784_v18  ;;  %v744_v41 = vld [vmem:[%s2195_s9 + $0x38] sm:$0xff] }
   0xf   : > { %s541_s27 = scalar_lea.vmem %s2186_s0, %s1886_s14  ;;  %v1585_v1 = vld [vmem:[%s544_s24] ss:$0 sm:$0xff]  ;;  %s548_s30 = scalar_lea.vmem %s2188_s2, %s1886_s14  ;;  %1663 = vmatprep.mubr.msk.bf16.mxu1 %vm1785_vm1, %v1784_v18  ;;  %v1786_v21 = vmov 65535   ;;  %1655 = vmatprep.mubr.msk.bf16.mxu0 %vm1785_vm1, %v1784_v18  ;;  %v601_v23 = vpack.c.bf16 %v598_v20, %v597_v17  ;;  %vm657_vm4 = vcmask 261120   ;;  %v747_v42 = vld [vmem:[%s2195_s9 + $0x50] sm:$0xff]  ;;  %v746_v45 = vld [vmem:[%s2195_s9 + $0x48] sm:$0xff] }
  0x10   : > { %v564_v2 = vld [vmem:[%s541_s27] sm:$0xff]  ;;  %s1623_s26 = sshll.u32 %s2203_s21, 4  ;;  %v612_v22 = vsel %vm610_vm2, 4294967295, %v1786_v21  ;;  %1660 = vmatpush3.bf16.msra.mxu1 %v602_v19  ;;  %s1937_s17 = scalar_lea.vmem %s2201_s15, %s1886_s14  ;;  %v753_v43 = vpack.c.bf16 %v747_v42, %v744_v41  ;;  %v743_v44 = vld [vmem:[%s2195_s9 + $0x30] sm:$0xff]  ;;  %v748_v48 = vld [vmem:[%s2195_s9 + $0x58] sm:$0xff]  ;;  %v1787_v59 = vmov 0  }
  0x11   : > { %v572_v3 = vmul.f32 %v1585_v1, %v564_v2  ;;  %s553_s29 = scalar_lea.vmem %s2189_s3, %s1623_s26  ;;  %v595_v24 = vld [vmem:[%s548_s30] sm:$0xff]  ;;  %v1925_v27 = vsel %vm611_vm3, %v612_v22, 0  ;;  %1661 = vmatprep.subr.bf16.mxu1 %v1784_v18  ;;  %v752_v47 = vpack.c.bf16 %v746_v45, %v743_v44  ;;  %v738_v50 = vld [vmem:[%s2195_s9 + $0x8] sm:$0xff]  ;;  %v740_v54 = vld [vmem:[%s2195_s9 + $0x18] sm:$0xff]  ;;  %s1735_s23 = smul.u32 48, %s2203_s21  ;;  %vm962_vm5 = vcmask 523264  }
  0x12   : > { %v604_v25 = vld [vmem:[%s553_s29] sm:$0xff]  ;;  %v605_v26 = vld [vmem:[%s553_s29 + $0x8] sm:$0x1]  ;;  %v596_v29 = vpack.c.bf16 %v595_v24, %v595_v24  ;;  %v739_v56 = vld [vmem:[%s2195_s9 + $0x10] sm:$0xff]  ;;  %s1788_s21 = smov 32   ;;  %s1789_s27 = smov 64  }
  0x13   : > { %v574_v4 = vsel %vm573_vm0, %v572_v3, -inf  ;;  %v606_v28 = vpack.c.bf16 %v605_v26, %v604_v25  ;;  %v745_v46 = vld [vmem:[%s2195_s9 + $0x40] sm:$0xff]  ;;  %v742_v57 = vld [vmem:[%s2195_s9 + $0x28] sm:$0xff]  ;;  %s2012_s26 = scalar_lea.vmem %s2190_s4, %s1735_s23  ;;  %vm1474_vm6 = vcmask 80968  }
  0x14   : > { %575 = vmax.xlane.f32.xlu0 %v574_v4  ;;  %1662 = vmatpush3.bf16.msra.mxu1 %v601_v23  ;;  %v754_v49 = vpack.c.bf16 %v748_v48, %v745_v46  ;;  %v741_v51 = vld [vmem:[%s2195_s9 + $0x20] sm:$0xff]  ;;  %v751_v58 = vpack.c.bf16 %v742_v57, %v739_v56  ;;  %v720_v17 = vld [vmem:[%s2012_s26 + $0x8] sm:$0x1] }
  0x15   : > { %v615_v30 = vand.u32 %v1925_v27, %v606_v28  ;;  %1667 = vmatprep.subr.bf16.mxu1 %v1784_v18  ;;  %v750_v52 = vpack.c.bf16 %v741_v51, %v738_v50  ;;  %v737_v53 = vld [vmem:[%s2195_s9] sm:$0xff]  ;;  %v721_v28 = vld [vmem:[%s2012_s26 + $0x10] sm:$0xff]  ;;  %v724_v42 = vld [vmem:[%s2012_s26 + $0x28] sm:$0x1] }
  0x16   : > { %v749_v55 = vpack.c.bf16 %v740_v54, %v737_v53  ;;  %v1588_v60 = vld [vmem:[%s2192_s6] ss:$0 sm:$0xff] }
  0x17   : > { %1654 = vmatpush3.bf16.msra.mxu0 %v615_v30  ;;  %1664 = vmatmul.mubr.msk.bf16.vlgmr.msra.gmra.mxu1 %vm657_vm4, %v596_v29  ;;  %v1992_v4 = vld [vmem:[%s2194_s8] sm:$0x1]  ;;  %v722_v29 = vld [vmem:[%s2012_s26 + $0x18] sm:$0x1] }
  0x18   : > { %1671 = vmatprep.mubr.msk.bf16.mxu1 %vm1785_vm1, %v1784_v18  ;;  %770 = vmatprep.subr.bf16.mxu0 %v753_v43  ;;  %v719_v16 = vld [vmem:[%s2012_s26] sm:$0xff] }
  0x19   : > { %1668 = vmatpush3.bf16.msra.mxu1 %v754_v49  ;;  %v2018_v23 = vpack.c.bf16 %v720_v17, %v719_v16  ;;  %v723_v41 = vld [vmem:[%s2012_s26 + $0x20] sm:$0xff] }
  0x1a   : > { %1669 = vmatprep.subr.bf16.mxu1 %v1784_v18  ;;  %v2061_v45 = vpack.c.bf16 %v724_v42, %v723_v41  ;;  %v2075_v50 = vld [vmem:[%s2197_s11] ss:$0 sm:$0xff]  ;;  %v1611_v41 = vld [vmem:[%s2195_s9 + $0xb8] sm:$0xff] }
  0x1d   : > { %1670 = vmatpush3.bf16.msra.mxu1 %v751_v58 }
  0x1e   : > { %1681 = vmatprep.subr.bf16.mxu1 %v1784_v18 }
  0x9d   : > { %v576_v5 = vpop.xlane.xlu0 %575 }
  0x9e   : > { %v577_v6 = vsub.f32 %v572_v3, %v576_v5 }
  0xa0   : > { %v578_v7 = vmul.f32 1.442695, %v577_v6 }
  0xa2   : > { %1752 = vpow2.f32 %v578_v7 }
  0xaf   : > { %v1753_v8 = vpop.eup %1752 }
  0xb0   : > { %v580_v9 = vsel %vm573_vm0, %v1753_v8, 0.0 }
  0xb1   : > { %581 = vadd.xlane.f32.xlu0 %v580_v9 }
  0xd7   : > { %v695_v37 = vpop.f32.mrf.mxu1 }
  0xd9   : > { %v1665_v38 = vpop.f32.mrf.mxu1 }
  0xda   : > { %v729_v38 = vld [vmem:[%s2196_s10 + $0x8] sm:$0xff] }
  0xdb   : > { %v698_v39 = vpop.f32.mrf.mxu1 }
  0xdd   : > { %v1666_v40 = vpop.f32.mrf.mxu1 }
 0x13a   : > { %v582_v10 = vpop.xlane.xlu0 %581 }
 0x13b   : > { %1754 = vrcp.f32 %v582_v10 }
 0x148   : > { %v1755_v11 = vpop.eup %1754 }
 0x149   : > { %v584_v12 = vmul.f32 %v1755_v11, %v1753_v8 }
 0x14b   : > { %v585_v13 = vmul.f32 %v1585_v1, %v584_v12  ;;  %v1589_v1 = vld [vmem:[%s2193_s7] ss:$0 sm:$0xff] }
 0x14d   : > { %v586_v14 = vsel %vm573_vm0, %v585_v13, 0.0 }
 0x14e   : > { %587 = vadd.xlane.f32.xlu1 %v586_v14 }
 0x1d7   : > { %v588_v31 = vpop.xlane.xlu1 %587 }
 0x1d8   : > { %v589_v32 = vadd.f32 1e-13, %v588_v31  ;;  %v730_v31 = vld [vmem:[%s2196_s10 + $0x10] sm:$0xff] }
 0x1da   : > { %1756 = vrcp.f32 %v589_v32  ;;  %v731_v32 = vld [vmem:[%s2196_s10 + $0x18] sm:$0xff] }
 0x1e7   : > { %v1757_v33 = vpop.eup %1756 }
 0x1e8   : > { %v591_v34 = vmul.f32 %v1757_v33, %v585_v13 }
 0x1ea   : > { %v592_v35 = vsel %vm573_vm0, %v591_v34, -inf  ;;  %v603_v36 = vpack.c.bf16 %v591_v34, %v591_v34  ;;  %1469 = vst.msk [vmem:[%s1937_s17] sm:$0xff] %vm573_vm0, %v591_v34  ;;  %v2038_v34 = vpack.c.bf16 %v722_v29, %v721_v28 }
 0x1eb   : > { %593 = vmax.xlane.f32.xlu1 %v592_v35 }
 0x1ec   : > { %1656 = vmatmul.mubr.msk.bf16.vlgmr.msra.gmra.mxu0 %vm573_vm0, %v603_v36  ;;  %v2040_v36 = vpack.c.bf16 %v731_v32, %v730_v31  ;;  %v1607_v32 = vld [vmem:[%s2195_s9 + $0x98] sm:$0xff] }
 0x1ed   : > { %771 = vmatpush1.bf16.msra.mxu0 %v752_v47  ;;  %790 = vmatprep.mubr.bf16.mxu0 %v1787_v59 }
 0x1ee   : > { %772 = vmatprep.subr.bf16.mxu0 %v750_v52 }
 0x1f1   : > { %773 = vmatpush1.bf16.msra.mxu0 %v749_v55 }
 0x1f2   : > { %1675 = vmatprep.subr.bf16.mxu0 %v1784_v18 }
 0x274   : > { %v594_v61 = vpop.xlane.xlu1 %593 }
 0x275   : > { %v708_v63 = vmul.f32 %v1588_v60, %v594_v61 }
 0x2ac   : > { %v651_v62 = vpop.f32.mrf.mxu0 }
 0x2ad   : > { %v696_v0 = vadd.f32 %v695_v37, %v651_v62  ;;  %v728_v37 = vld [vmem:[%s2196_s10] sm:$0xff] }
 0x2ae   : > { %v1657_v2 = vpop.f32.mrf.mxu0  ;;  %v2052_v40 = vpack.c.bf16 %v729_v38, %v728_v37  ;;  %v1609_v38 = vld [vmem:[%s2195_s9 + $0xa8] sm:$0xff] }
 0x2af   : > { %v709_v3 = vadd.f32 %v708_v63, %v696_v0 }
 0x2b0   : > { %v654_v5 = vpop.f32.mrf.mxu0 }
 0x2b1   : > { %v1994_v6 = vadd.f32 %v1589_v1, %v709_v3 }
 0x2b2   : > { %v1658_v7 = vpop.f32.mrf.mxu0 }
 0x2b3   : > { %v1998_v8 = vpack.c.bf16 %v1992_v4, %v1994_v6 }
 0x2b5   : > { %1590 = vmatmul.mubr.msk.bf16.vlgmr.msra.gmra.mxu0 %vm657_vm4, %v1998_v8  ;;  %1672 = vmatmul.mubr.msk.bf16.vlgmr.msra.gmra.mxu1 %vm657_vm4, %v1998_v8 }
 0x2b6   : > { %1677 = vmatprep.mubr.msk.bf16.mxu0 %vm1785_vm1, %v1784_v18  ;;  %1683 = vmatprep.mubr.msk.bf16.mxu1 %vm1785_vm1, %v1784_v18 }
 0x375   : > { %v792_v9 = vpop.f32.mrf.mxu0  ;;  %v835_v10 = vpop.f32.mrf.mxu1 }
 0x377   : > { %v794_v11 = vpop.f32.mrf.mxu0  ;;  %v1673_v12 = vpop.f32.mrf.mxu1 }
 0x379   : > { %v796_v13 = vpop.f32.mrf.mxu0  ;;  %v838_v14 = vpop.f32.mrf.mxu1 }
 0x37a   : > { %v842_v15 = vpack.c.bf16 %v796_v13, %v792_v9  ;;  %v956_v24 = vpack.c.bf16 %v838_v14, %v835_v10 }
 0x37b   : > { %v798_v19 = vpop.f32.mrf.mxu0  ;;  %v1674_v20 = vpop.f32.mrf.mxu1 }
 0x37c   : > { %v847_v21 = vand.u32 %v842_v15, %v1925_v27  ;;  %v898_v22 = vpack.c.bf16 %v798_v19, %v794_v11  ;;  %901 = vrot.lane.b32.xlu0 %v842_v15, %s1788_s21 }
 0x37e   : > { %1676 = vmatpush3.bf16.msra.mxu0 %v847_v21  ;;  %903 = vrot.lane.b32.xlu1 %v898_v22, %s1788_s21 }
 0x37f   : > { %1687 = vmatprep.subr.bf16.mxu0 %v1784_v18 }
 0x381   : > { %1678 = vmatmul.mubr.msk.bf16.vlgmr.msra.gmra.mxu0 %vm573_vm0, %v2018_v23 }
 0x382   : > { %958 = vrot.lane.b32.xlu1 %v898_v22, %s1789_s27  ;;  %1689 = vmatprep.mubr.msk.bf16.mxu0 %vm1785_vm1, %v1784_v18 }
 0x386   : > { %960 = vrot.lane.b32.xlu1 %v956_v24, %s1789_s27 }
 0x3ee   : > { %v902_v25 = vpop.permute.xlu0 %901 }
 0x3f0   : > { %v904_v26 = vpop.permute.xlu1 %903 }
 0x3f1   : > { %v906_v30 = vsel %vm657_vm4, %v902_v25, %v904_v26 }
 0x3f2   : > { %v911_v33 = vand.u32 %v906_v30, %v1925_v27 }
 0x3f4   : > { %1682 = vmatpush3.bf16.msra.mxu1 %v911_v33  ;;  %v959_v35 = vpop.permute.xlu1 %958  ;;  %v1610_v33 = vld [vmem:[%s2195_s9 + $0xb0] sm:$0xff] }
 0x3f5   : > { %1693 = vmatprep.subr.bf16.mxu1 %v1784_v18  ;;  %v1138_v37 = vpack.c.bf16 %v1610_v33, %v1607_v32 }
 0x3f7   : > { %1684 = vmatmul.mubr.msk.bf16.vlgmr.msra.gmra.mxu1 %vm573_vm0, %v2038_v34 }
 0x3f8   : > { %1694 = vmatpush3.bf16.msra.mxu1 %v2040_v36  ;;  %v961_v39 = vpop.permute.xlu1 %960  ;;  %1697 = vmatprep.mubr.msk.bf16.mxu1 %vm1785_vm1, %v1784_v18 }
 0x3f9   : > { %v963_v43 = vsel %vm962_vm5, %v959_v35, %v961_v39  ;;  %1695 = vmatprep.subr.bf16.mxu1 %v1784_v18  ;;  %v1606_v35 = vld [vmem:[%s2195_s9 + $0x90] sm:$0xff]  ;;  %v1608_v39 = vld [vmem:[%s2195_s9 + $0xa0] sm:$0xff] }
 0x3fa   : > { %v968_v44 = vand.u32 %v963_v43, %v1925_v27  ;;  %v1137_v43 = vpack.c.bf16 %v1609_v38, %v1606_v35 }
 0x3fc   : > { %1688 = vmatpush3.bf16.msra.mxu0 %v968_v44  ;;  %1696 = vmatpush3.bf16.msra.mxu1 %v2052_v40  ;;  %v1139_v44 = vpack.c.bf16 %v1611_v41, %v1608_v39 }
 0x3fd   : > { %1701 = vmatprep.subr.bf16.mxu1 %v1784_v18  ;;  %1158 = vmatprep.subr.bf16.mxu0 %v1138_v37 }
 0x3ff   : > { %1690 = vmatmul.mubr.msk.bf16.vlgmr.msra.gmra.mxu0 %vm573_vm0, %v2061_v45  ;;  %1698 = vmatmul.mubr.msk.bf16.vlgmr.msra.gmra.mxu1 %vm657_vm4, %v1998_v8 }
 0x400   : > { %1178 = vmatprep.mubr.bf16.mxu0 %v1787_v59  ;;  %1705 = vmatprep.mubr.msk.bf16.mxu1 %vm1785_vm1, %v1784_v18  ;;  %v2082_v59 = vld [vmem:[%s2198_s12] ss:$0 sm:$0xff] }
 0x401   : > { %1702 = vmatpush3.bf16.msra.mxu1 %v1139_v44  ;;  %1159 = vmatpush1.bf16.msra.mxu0 %v1137_v43 }
 0x402   : > { %1703 = vmatprep.subr.bf16.mxu1 %v1784_v18 }
 0x441   : > { %v883_v46 = vpop.f32.mrf.mxu0 }
 0x442   : > { %v896_v51 = vadd.f32 %v2075_v50, %v883_v46  ;;  %v1601_v46 = vld [vmem:[%s2195_s9 + $0x68] sm:$0xff] }
 0x443   : > { %v1679_v47 = vpop.f32.mrf.mxu0 }
 0x444   : > { %v1604_v47 = vld [vmem:[%s2195_s9 + $0x80] sm:$0xff] }
 0x445   : > { %v886_v48 = vpop.f32.mrf.mxu0 }
 0x446   : > { %v897_v54 = vadd.f32 %v2075_v50, %v886_v48  ;;  %v1600_v48 = vld [vmem:[%s2195_s9 + $0x60] sm:$0xff] }
 0x447   : > { %v1680_v49 = vpop.f32.mrf.mxu0 }
 0x448   : > { %v1135_v49 = vpack.c.bf16 %v1604_v47, %v1601_v46 }
 0x44a   : > { %1160 = vmatprep.subr.bf16.mxu0 %v1135_v49 }
 0x4b7   : > { %v947_v52 = vpop.f32.mrf.mxu1 }
 0x4b8   : > { %v954_v53 = vadd.f32 %v947_v52, %v896_v51  ;;  %v1603_v51 = vld [vmem:[%s2195_s9 + $0x78] sm:$0xff]  ;;  %v1602_v52 = vld [vmem:[%s2195_s9 + $0x70] sm:$0xff] }
 0x4b9   : > { %v1685_v55 = vpop.f32.mrf.mxu1 }
 0x4bb   : > { %v950_v56 = vpop.f32.mrf.mxu1 }
 0x4bc   : > { %v955_v57 = vadd.f32 %v950_v56, %v897_v54 }
 0x4bd   : > { %v1686_v58 = vpop.f32.mrf.mxu1 }
 0x4bf   : > { %v1004_v60 = vpop.f32.mrf.mxu0  ;;  %v1053_v61 = vpop.f32.mrf.mxu1 }
 0x4c0   : > { %v1011_v62 = vadd.f32 %v1004_v60, %v954_v53  ;;  %v1054_v63 = vadd.f32 %v2082_v59, %v1053_v61  ;;  %v1605_v53 = vld [vmem:[%s2195_s9 + $0x88] sm:$0xff] }
 0x4c1   : > { %v1691_v0 = vpop.f32.mrf.mxu0  ;;  %v1699_v1 = vpop.f32.mrf.mxu1  ;;  %v1136_v54 = vpack.c.bf16 %v1605_v53, %v1602_v52 }
 0x4c2   : > { %1076 = vrot.lane.b32.xlu0 %v1054_v63, %s1789_s27  ;;  %v1060_v10 = vadd.f32 %v1054_v63, %v1011_v62 }
 0x4c3   : > { %v1007_v2 = vpop.f32.mrf.mxu0  ;;  %v1056_v3 = vpop.f32.mrf.mxu1  ;;  %1704 = vmatpush3.bf16.msra.mxu1 %v1136_v54 }
 0x4c4   : > { %v1012_v5 = vadd.f32 %v1007_v2, %v955_v57  ;;  %v1057_v7 = vadd.f32 %v2082_v59, %v1056_v3  ;;  %v1598_v11 = vmul.f32 -1.442695, %v1060_v10  ;;  %1715 = vmatprep.subr.bf16.mxu1 %v1784_v18 }
 0x4c5   : > { %v1700_v8 = vpop.f32.mrf.mxu1  ;;  %v1692_v9 = vpop.f32.mrf.mxu0 }
 0x4c6   : > { %1078 = vrot.lane.b32.xlu1 %v1057_v7, %s1789_s27  ;;  %v1061_v12 = vadd.f32 %v1057_v7, %v1012_v5  ;;  %1758 = vpow2.f32 %v1598_v11 }
 0x4c8   : > { %v1599_v13 = vmul.f32 -1.442695, %v1061_v12 }
 0x4ca   : > { %1760 = vpow2.f32 %v1599_v13 }
 0x4d3   : > { %v1759_v14 = vpop.eup %1758 }
 0x4d4   : > { %v1068_v15 = vadd.f32 1.0, %v1759_v14 }
 0x4d6   : > { %1762 = vrcp.f32 %v1068_v15 }
 0x4d7   : > { %v1761_v16 = vpop.eup %1760 }
 0x4d8   : > { %v1069_v17 = vadd.f32 1.0, %v1761_v16 }
 0x4da   : > { %1764 = vrcp.f32 %v1069_v17 }
 0x4e3   : > { %v1763_v19 = vpop.eup %1762 }
 0x4e4   : > { %v1096_v58 = vsub.f32 1.0, %v1763_v19 }
 0x4e7   : > { %v1765_v22 = vpop.eup %1764 }
 0x4e8   : > { %v1097_v61 = vsub.f32 1.0, %v1765_v22 }
 0x534   : > { %v1077_v20 = vpop.permute.xlu0 %1076 }
 0x535   : > { %v1082_v21 = vmul.f32 %v1763_v19, %v1077_v20 }
 0x537   : > { %1086 = vrot.lane.b32.xlu0 %v1082_v21, %s1789_s27 }
 0x538   : > { %v1079_v24 = vpop.permute.xlu1 %1078 }
 0x539   : > { %v1083_v25 = vmul.f32 %v1765_v22, %v1079_v24 }
 0x53b   : > { %1088 = vrot.lane.b32.xlu1 %v1083_v25, %s1789_s27 }
 0x5a9   : > { %v1087_v26 = vpop.permute.xlu0 %1086 }
 0x5aa   : > { %v1092_v28 = vadd.f32 %v1087_v26, %v1011_v62 }
 0x5ac   : > { %1766 = vtanh.f32 %v1092_v28 }
 0x5ad   : > { %v1089_v29 = vpop.permute.xlu1 %1088 }
 0x5ae   : > { %v1093_v30 = vadd.f32 %v1089_v29, %v1012_v5 }
 0x5b0   : > { %1768 = vtanh.f32 %v1093_v30 }
 0x5b9   : > { %v1767_v31 = vpop.eup %1766 }
 0x5ba   : > { %1100 = vrot.lane.b32.xlu0 %v1767_v31, %s1790_s28 }
 0x5bd   : > { %v1769_v42 = vpop.eup %1768 }
 0x5be   : > { %1110 = vrot.lane.b32.xlu0 %v1994_v6, %s1788_s21  ;;  %1102 = vrot.lane.b32.xlu1 %v1769_v42, %s1790_s28  ;;  %v1134_v6 = vpack.c.bf16 %v1603_v51, %v1600_v48 }
 0x5c0   : > { %1161 = vmatpush1.bf16.msra.mxu0 %v1134_v6 }
 0x5c1   : > { %1709 = vmatprep.subr.bf16.mxu0 %v1784_v18 }
 0x5c2   : > { %1112 = vrot.lane.b32.xlu1 %v1992_v4, %s1788_s21 }
 0x62c   : > { %v1101_v55 = vpop.permute.xlu0 %1100 }
 0x62d   : > { %v1106_v63 = vmul.f32 %v1101_v55, %v1096_v58 }
 0x630   : > { %v1111_v56 = vpop.permute.xlu0 %1110  ;;  %v1103_v57 = vpop.permute.xlu1 %1102 }
 0x631   : > { %v1116_v60 = vmul.f32 %v1763_v19, %v1111_v56  ;;  %v1107_v0 = vmul.f32 %v1103_v57, %v1097_v61 }
 0x633   : > { %v2135_v2 = vadd.f32 %v1116_v60, %v1106_v63 }
 0x634   : > { %v1113_v62 = vpop.permute.xlu1 %1112 }
 0x635   : > { %v1117_v1 = vmul.f32 %v1765_v22, %v1113_v62 }
 0x637   : > { %v1119_v3 = vadd.f32 %v1117_v1, %v1107_v0 }
 0x639   : > { %v1120_v4 = vpack.c.bf16 %v1119_v3, %v2135_v2  ;;  %v1620_v3 = vld [vmem:[#allocation2] ss:$0 sm:$0xff] }
 0x63b   : > { %1141 = vrot.lane.b32.xlu0 %v1120_v4, %s1790_s28 }
 0x6ad   : > { %v1142_v5 = vpop.permute.xlu0 %1141 }
 0x6ae   : > { %1612 = vmatmul.mubr.msk.bf16.vlgmr.msra.gmra.mxu0 %vm657_vm4, %v1142_v5  ;;  %1706 = vmatmul.mubr.msk.bf16.vlgmr.msra.gmra.mxu1 %vm657_vm4, %v1142_v5 }
 0x6af   : > { %1711 = vmatprep.mubr.msk.bf16.mxu0 %vm1785_vm1, %v1784_v18  ;;  %1717 = vmatprep.mubr.msk.bf16.mxu1 %vm1785_vm1, %v1784_v18 }
 0x76e   : > { %v1180_v7 = vpop.f32.mrf.mxu0  ;;  %v1223_v8 = vpop.f32.mrf.mxu1 }
 0x770   : > { %v1182_v9 = vpop.f32.mrf.mxu0  ;;  %v1707_v10 = vpop.f32.mrf.mxu1 }
 0x772   : > { %v1184_v11 = vpop.f32.mrf.mxu0  ;;  %v1226_v12 = vpop.f32.mrf.mxu1 }
 0x773   : > { %v1230_v13 = vpack.c.bf16 %v1184_v11, %v1180_v7  ;;  %v1327_v19 = vpack.c.bf16 %v1226_v12, %v1223_v8 }
 0x774   : > { %v1186_v14 = vpop.f32.mrf.mxu0  ;;  %v1708_v15 = vpop.f32.mrf.mxu1 }
 0x775   : > { %v1232_v16 = vand.u32 %v1230_v13, %v1925_v27  ;;  %v1275_v17 = vpack.c.bf16 %v1186_v14, %v1182_v9  ;;  %1278 = vrot.lane.b32.xlu1 %v1230_v13, %s1788_s21 }
 0x777   : > { %1710 = vmatpush3.bf16.msra.mxu0 %v1232_v16  ;;  %1280 = vrot.lane.b32.xlu0 %v1275_v17, %s1788_s21 }
 0x778   : > { %1721 = vmatprep.subr.bf16.mxu0 %v1784_v18 }
 0x779   : > { %1329 = vrot.lane.b32.xlu1 %v1275_v17, %s1789_s27 }
 0x77a   : > { %1712 = vmatmul.mubr.msk.bf16.vlgmr.msra.gmra.mxu0 %vm573_vm0, %v2018_v23 }
 0x77b   : > { %1331 = vrot.lane.b32.xlu0 %v1327_v19, %s1789_s27  ;;  %1723 = vmatprep.mubr.msk.bf16.mxu0 %vm1785_vm1, %v1784_v18 }
 0x7e7   : > { %v1279_v20 = vpop.permute.xlu1 %1278 }
 0x7e9   : > { %v1281_v21 = vpop.permute.xlu0 %1280 }
 0x7ea   : > { %v1282_v22 = vsel %vm657_vm4, %v1279_v20, %v1281_v21 }
 0x7eb   : > { %v1284_v24 = vand.u32 %v1282_v22, %v1925_v27  ;;  %v1330_v25 = vpop.permute.xlu1 %1329 }
 0x7ed   : > { %1716 = vmatpush3.bf16.msra.mxu1 %v1284_v24  ;;  %v1332_v26 = vpop.permute.xlu0 %1331 }
 0x7ee   : > { %v1333_v28 = vsel %vm962_vm5, %v1330_v25, %v1332_v26  ;;  %1727 = vmatprep.subr.bf16.mxu1 %v1784_v18 }
 0x7ef   : > { %v1335_v23 = vand.u32 %v1333_v28, %v1925_v27 }
 0x7f0   : > { %1718 = vmatmul.mubr.msk.bf16.vlgmr.msra.gmra.mxu1 %vm573_vm0, %v2038_v34 }
 0x7f1   : > { %1722 = vmatpush3.bf16.msra.mxu0 %v1335_v23  ;;  %1728 = vmatpush3.bf16.msra.mxu1 %v2040_v36 }
 0x7f2   : > { %1729 = vmatprep.subr.bf16.mxu1 %v1784_v18  ;;  %1731 = vmatprep.mubr.msk.bf16.mxu1 %vm1785_vm1, %v1784_v18 }
 0x7f4   : > { %1724 = vmatmul.mubr.msk.bf16.vlgmr.msra.gmra.mxu0 %vm573_vm0, %v2061_v45 }
 0x7f5   : > { %1730 = vmatpush3.bf16.msra.mxu1 %v2052_v40 }
 0x7f8   : > { %1732 = vmatmul.mubr.msk.bf16.vlgmr.msra.gmra.mxu1 %vm657_vm4, %v1142_v5 }
 0x83a   : > { %v1268_v29 = vpop.f32.mrf.mxu0 }
 0x83b   : > { %v1274_v34 = vadd.f32 %v2075_v50, %v1268_v29 }
 0x83c   : > { %v1713_v27 = vpop.f32.mrf.mxu0 }
 0x83e   : > { %v1271_v30 = vpop.f32.mrf.mxu0 }
 0x840   : > { %v1714_v31 = vpop.f32.mrf.mxu0 }
 0x8b0   : > { %v1320_v32 = vpop.f32.mrf.mxu1 }
 0x8b1   : > { %v1326_v36 = vadd.f32 %v1320_v32, %v1274_v34 }
 0x8b2   : > { %v1719_v33 = vpop.f32.mrf.mxu1 }
 0x8b4   : > { %v1323_v35 = vpop.f32.mrf.mxu1  ;;  %v1371_v37 = vpop.f32.mrf.mxu0 }
 0x8b5   : > { %v1377_v38 = vadd.f32 %v1371_v37, %v1326_v36 }
 0x8b6   : > { %v1720_v18 = vpop.f32.mrf.mxu1  ;;  %v1725_v39 = vpop.f32.mrf.mxu0 }
 0x8b8   : > { %v1412_v41 = vpop.f32.mrf.mxu1  ;;  %v1374_v45 = vpop.f32.mrf.mxu0 }
 0x8b9   : > { %v1413_v40 = vadd.f32 %v2082_v59, %v1412_v41  ;;  %v1619_v59 = vld [vmem:[%s2199_s13] ss:$0 sm:$0xff] }
 0x8ba   : > { %v1733_v42 = vpop.f32.mrf.mxu1  ;;  %v1726_v43 = vpop.f32.mrf.mxu0 }
 0x8bb   : > { %1426 = vrot.lane.b32.xlu1 %v1413_v40, %s1789_s27  ;;  %v1418_v47 = vadd.f32 %v1413_v40, %v1377_v38 }
 0x8bc   : > { %v1415_v44 = vpop.f32.mrf.mxu1 }
 0x8bd   : > { %v1618_v50 = vmul.f32 -1.442695, %v1418_v47 }
 0x8be   : > { %v1734_v46 = vpop.f32.mrf.mxu1 }
 0x8bf   : > { %1770 = vpow2.f32 %v1618_v50 }
 0x8cc   : > { %v1771_v48 = vpop.eup %1770 }
 0x8cd   : > { %v1422_v49 = vadd.f32 1.0, %v1771_v48 }
 0x8cf   : > { %1772 = vrcp.f32 %v1422_v49 }
 0x8dc   : > { %v1773_v51 = vpop.eup %1772 }
 0x8dd   : > { %v1436_v56 = vsub.f32 1.0, %v1773_v51  ;;  %v1442_v60 = vmul.f32 %v1773_v51, %v2135_v2 }
 0x92d   : > { %v1427_v52 = vpop.permute.xlu1 %1426 }
 0x92e   : > { %v1429_v53 = vmul.f32 %v1773_v51, %v1427_v52 }
 0x930   : > { %1431 = vrot.lane.b32.xlu0 %v1429_v53, %s1789_s27 }
 0x934   : > { %1450 = vrot.lane.b32.xlu0 %v1619_v59, %s1788_s21  ;;  %s1791_s21 = smov 9  }
 0x9a2   : > { %v1432_v6 = vpop.permute.xlu0 %1431 }
 0x9a3   : > { %v1434_v54 = vadd.f32 %v1432_v6, %v1377_v38 }
 0x9a5   : > { %1774 = vtanh.f32 %v1434_v54 }
 0x9a6   : > { %v1451_v61 = vpop.permute.xlu0 %1450 }
 0x9b2   : > { %v1775_v55 = vpop.eup %1774 }
 0x9b3   : > { %1438 = vrot.lane.b32.xlu1 %v1775_v55, %s1790_s28 }
 0xa25   : > { %v1439_v57 = vpop.permute.xlu1 %1438 }
 0xa26   : > { %v1441_v58 = vmul.f32 %v1439_v57, %v1436_v56 }
 0xa28   : > { %v1443_v62 = vadd.f32 %v1442_v60, %v1441_v58 }
 0xa2a   : > { %v1453_v63 = vmul.f32 %v1451_v61, %v1443_v62 }
 0xa2c   : > { %1455 = vrot.lane.b32.xlu1 %v1453_v63, %s1790_s28 }
 0xa9e   : > { %v1456_v0 = vpop.permute.xlu1 %1455 }
 0xa9f   : > { %v1458_v1 = vsel %vm657_vm4, %v1456_v0, 0.0 }
 0xaa0   : > { %1459 = vadd.xlane.f32.xlu0 %v1458_v1 }
 0xb29   : > { %v1460_v4 = vpop.xlane.xlu0 %1459 }
 0xb2a   : > { %v1468_v5 = vadd.f32 %v1620_v3, %v1460_v4 }
 0xb2c   : > { %1471 = vrot.lane.b32.xlu1 %v1468_v5, %s1791_s21 }
 0xb9e   : > { %v1472_v7 = vpop.permute.xlu1 %1471 }
 0xb9f   : > { %1475 = vst.msk [vmem:[%s1937_s17] sm:$0xff] %vm1474_vm6, %v1472_v7 }
 0xba0 PF: > { %s27_s20 = sadd.s32 1, %s1782_s20  }
 0xba1   : > { %p24_p4 = scmp.ge.s32.totalorder %s27_s20, 4  }
 0xba3   :  { %26 = sbr.rel (!%p24_p4) target bundleno = 3 (0x3), region = 123 }

</bundles_post_ra>
